<compile_context>
chip_gen: v7x
topology: tpu7x:2x2x1
jax: 0.10.0
libtpu: 0.0.40
codegen_flags: <defaults>
</compile_context>

<pallas_src>
import jax
import jax.numpy as jnp
from jax.experimental import pallas as pl
from jax.experimental.pallas import tpu as pltpu


def _avg_kernel(x_ref, o_ref):
    # x_ref: (TB, T, TC)   o_ref: (TB, TC)  -- lane/sublane-dense output slab.
    t = x_ref.shape[1]
    s = jnp.sum(x_ref[...].astype(jnp.float32), axis=1)   # XLU sublane reduce
    o_ref[...] = (s * (1.0 / t)).astype(o_ref.dtype)


def _avg_cluster_kernel(c_ref, x_ref, o_ref):
    # c_ref: (TB, 1)   x_ref: (TB, T, TC)   o_ref: (TB, TC)
    s = jnp.sum(x_ref[...].astype(jnp.float32), axis=1)
    inv = 1.0 / c_ref[...].astype(jnp.float32)             # one divide per row
    o_ref[...] = (s * inv).astype(o_ref.dtype)             # broadcast over TC


def _pick_tiles(b, t, c, itemsize, target_bytes):
    """Pick (TB, TC) batch/class tiles.

    Targets ~target_bytes per (TB, T, TC) input block.  TB is a multiple of 8
    (sublane alignment) unless it spans the full batch; TC is the full class
    axis when it fits, otherwise a multiple of 128 (lane alignment).  For
    large batches that would otherwise be a single block, TB is capped so the
    grid keeps >= 2 steps and both v7x TensorCores get work.
    """
    # Class-axis tile: full C if an 8-row block fits, else largest multiple
    # of 128 that does.
    if c <= 128 or 8 * t * c * itemsize <= target_bytes:
        tc = c
    else:
        tc = max(128, (target_bytes // (8 * t * itemsize * 128)) * 128)
        tc = min(tc, c)

    row_bytes = max(1, t * tc * itemsize)
    tb = int(target_bytes // row_bytes)
    if tb >= b:
        tb = b
    else:
        tb = max(8, (tb // 8) * 8)

    # Keep >= 2 grid steps for megacore sharding when everything would fit in
    # one block but the batch is big enough to be worth splitting.
    if tc == c and tb == b and b >= 16:
        half = -(-b // 2)            # ceil(B/2)
        half = -(-half // 8) * 8     # round up to a multiple of 8
        if half < b:
            tb = half
    return tb, tc


def segment_consensus(input_tensor, consensus_type="avg", cluster_set=None,
                      *, _target_block_bytes=8 << 20):
    """Pallas implementation of SegmentConsensus.forward (dim=1)."""
    if consensus_type == "identity":
        # Pure passthrough: a Pallas copy would only burn a full HBM round trip.
        return input_tensor

    if consensus_type != "avg":
        # Matches the PyTorch module: unknown consensus_type -> None.
        return None

    b, t, c = input_tensor.shape
    tb, tc = _pick_tiles(b, t, c, input_tensor.dtype.itemsize,
                         _target_block_bytes)
    grid = (pl.cdiv(b, tb), pl.cdiv(c, tc))

    out_shape = jax.ShapeDtypeStruct((b, c), input_tensor.dtype)
    out_spec = pl.BlockSpec((tb, tc), lambda i, j: (i, j))
    x_spec = pl.BlockSpec((tb, t, tc), lambda i, j: (i, 0, j))
    cparams = pltpu.CompilerParams(
        dimension_semantics=("parallel", "parallel"),
        vmem_limit_bytes=32 * 1024 * 1024,
    )

    if cluster_set is None:
        out2d = pl.pallas_call(
            _avg_kernel,
            out_shape=out_shape,
            grid_spec=pltpu.PrefetchScalarGridSpec(
                num_scalar_prefetch=0,
                grid=grid,
                in_specs=[x_spec],
                out_specs=out_spec,
            ),
            compiler_params=cparams,
        )(input_tensor)
    else:
        cluster_set = jnp.asarray(cluster_set).reshape(b, 1)
        c_spec = pl.BlockSpec((tb, 1), lambda i, j: (i, 0))
        out2d = pl.pallas_call(
            _avg_cluster_kernel,
            out_shape=out_shape,
            grid_spec=pltpu.PrefetchScalarGridSpec(
                num_scalar_prefetch=0,
                grid=grid,
                in_specs=[c_spec, x_spec],
                out_specs=out_spec,
            ),
            compiler_params=cparams,
        )(cluster_set, input_tensor)

    # keepdim=True semantics of the PyTorch reference.
    return out2d.reshape(b, 1, c)


if __name__ == "__main__":
    key = jax.random.PRNGKey(0)

    def _check(b, t, c, target=8 << 20):
        k1, k2 = jax.random.split(jax.random.fold_in(key, b * 10000 + t * 100 + c))
        x = jax.random.normal(k1, (b, t, c), dtype=jnp.float32)
        cluster = jax.random.uniform(k2, (b, 1), dtype=jnp.float32,
                                     minval=1.0, maxval=float(t))

        # --- 'avg' without cluster_set (mean over dim=1, keepdim) ---
        out_avg = jax.block_until_ready(
            segment_consensus(x, "avg", _target_block_bytes=target))
        ref_avg = jnp.mean(x, axis=1, keepdims=True)
        assert out_avg.shape == (b, 1, c)
        assert jnp.allclose(out_avg, ref_avg, atol=1e-5, rtol=1e-5)

        # --- 'avg' with cluster_set (sum over dim=1 / cluster_set broadcast) ---
        out_clu = jax.block_until_ready(
            segment_consensus(x, "avg", cluster, _target_block_bytes=target))
        ref_clu = jnp.sum(x, axis=1, keepdims=True) / cluster[:, :, None]
        assert out_clu.shape == (b, 1, c)
        assert jnp.allclose(out_clu, ref_clu, atol=1e-5, rtol=1e-5)

        # --- 'identity' (no kernel, no copy) ---
        out_id = jax.block_until_ready(
            segment_consensus(x, "identity", _target_block_bytes=target))
        assert out_id.shape == x.shape
        assert jnp.allclose(out_id, x)

    _check(16, 8, 128)                   # TB=8, grid (2,1): even batch tiles
    _check(20, 8, 128)                   # TB=16, grid (2,1): ragged last batch tile
    _check(6, 3, 96)                     # single full-batch block, odd T/C
    _check(16, 4, 256, target=16 << 10)  # tiny budget -> grid (2,2), C tiled
    _check(8, 4, 192, target=16 << 10)   # tiny budget -> ragged (masked) C tile

    # Unknown consensus type -> None, matching the PyTorch module.
    assert segment_consensus(jnp.zeros((2, 3, 4), jnp.float32), "max") is None

    print("KERNEL_OK")
</pallas_src>

<mosaic_0001>
module attributes {stable_mosaic.version = 11 : i64} {
  func.func @_avg_kernel(%arg0: i32, %arg1: i32, %arg2: memref<8x8x128xf32, #tpu.memory_space<vmem>>, %arg3: memref<8x128xf32, #tpu.memory_space<vmem>>) attributes {dimension_semantics = [#tpu.dimension_semantics<parallel>, #tpu.dimension_semantics<parallel>], iteration_bounds = array<i64: 2, 1>, scalar_prefetch = 0 : i64, scratch_operands = 0 : i64, tpu.core_type = #tpu.core_type<tc>, window_params = [{transform_indices = @transform_0, window_bounds = array<i64: 8, 8, 128>}, {transform_indices = @transform_1, window_bounds = array<i64: 8, 128>}]} {
    %c0 = arith.constant 0 : index
    %c0_0 = arith.constant 0 : index
    %c0_1 = arith.constant 0 : index
    %0 = vector.load %arg2[%c0, %c0_0, %c0_1] : memref<8x8x128xf32, #tpu.memory_space<vmem>>, vector<8x8x128xf32>
    %cst = arith.constant dense<0.000000e+00> : vector<8x128xf32>
    %1 = vector.multi_reduction <add>, %0, %cst [1] : vector<8x8x128xf32> to vector<8x128xf32>
    %cst_2 = arith.constant 1.250000e-01 : f32
    %2 = vector.broadcast %cst_2 : f32 to vector<8x128xf32>
    %3 = arith.mulf %1, %2 : vector<8x128xf32>
    %c0_3 = arith.constant 0 : index
    %c0_4 = arith.constant 0 : index
    %4 = vector.load %arg3[%c0_3, %c0_4] : memref<8x128xf32, #tpu.memory_space<vmem>>, vector<8x128xf32>
    tpu.vector_store %arg3[%c0_3, %c0_4], %3 {strides = array<i32>} : memref<8x128xf32, #tpu.memory_space<vmem>>, vector<8x128xf32>,
    return
  }
  func.func @transform_0(%arg0: i32, %arg1: i32) -> (i32, i32, i32) {
    %c0_i32 = arith.constant 0 : i32
    %c0_i32_0 = arith.constant 0 : i32
    return %arg0, %c0_i32, %arg1 : i32, i32, i32
  }
  func.func @transform_1(%arg0: i32, %arg1: i32) -> (i32, i32) {
    %c0_i32 = arith.constant 0 : i32
    return %arg0, %arg1 : i32, i32
  }
}

</mosaic_0001>

<bundles_post_ra>
// kernel: tpu_custom_call.1
= control target key start
LH: loop header
LB: loop body
LE: loop exit
PB: predicated region body
PF: predicated region fallthrough
CT: control target
= control target key end

     0   :  { %6 = vsyncpa [#allocation3], 0  ;;  %s720_s0 = inlined_call_operand.hbm [shape: f32[16,8,128], index: 0, kind: input, shape index: {}]   ;;  %s721_s1 = inlined_call_operand.hbm [shape: f32[16,128], index: 1, kind: output, shape index: {}]  }
   0x1   :  { %8 = vsyncpa [#allocation3 + $0x1], 0 }
   0x2   :  { %9 = vsyncpa [#allocation4], 0 }
   0x3   :  { %11 = vsyncpa [#allocation4 + $0x1], 0  ;;  %s544_s6 = smov 0   ;;  %s546_s7 = smov 0  }
   0x4   :  { %s548_s8 = smov 0   ;;  %s550_s9 = smov 0  }
   0x5   :  { %s552_s10 = smov 0   ;;  %s554_s11 = smov 0  }
   0x6 LB: > { %s337_s12 = sadd.s32 4294967295, %s528_s11   ;;  %s338_s13 = sadd.s32 4294967294, %s528_s11   ;;  %s528_s11 = sphi %s554_s11, %s17_s11   ;;  %s524_s10 = sphi %s552_s10, %s736_s10   ;;  %s520_s9 = sphi %s550_s9, %s735_s9   ;;  %s516_s8 = sphi %s548_s8, %s734_s8   ;;  %s512_s7 = sphi %s546_s7, %s733_s7   ;;  %s508_s6 = sphi %s544_s6, %s732_s6  }
   0x7   : > { %s29_s14 = sadd.s32 1, %s524_s10  ;;  %s38_s15 = sadd.s32 1, %s516_s8 }
   0x8   : > { %p31_p0 = scmp.ge.s32.totalorder %s29_s14, 2  ;;  %p45_p1 = scmp.ne.s32.totalorder %s516_s8, %s512_s7 }
   0x9   : > { %p46_p2 = scmp.eq.s32.totalorder %s528_s11, 0  ;;  %p51_p3 = scmp.ne.s32.totalorder %s512_s7, %s508_s6 }
   0xa   : > { %s738_s14 = smov (%p31_p0, %s29_s14), 0  ;;  %p52_p5 = scmp.eq.s32.totalorder %s337_s12, 0 }
   0xb   : > { %p585_p4 = por %p46_p2, %p45_p1  ;;  %s33_s17 = ssub.s32 %s524_s10, %s738_s14 }
   0xc   : > { %p77_p6 = scmp.eq.s32.totalorder %s337_s12, 1  ;;  %p36_p7 = scmp.eq.s32.totalorder %s33_s17, 0 }
   0xd   : > { %p591_p8 = por %p52_p5, %p51_p3  ;;  %p83_p10 = scmp.eq.s32.totalorder %s338_s13, 1 }
   0xe   : > { %p595_p9 = por %p77_p6, %p45_p1  ;;  %p364_p13 = scmp.lt.s32.totalorder %s528_s11, 2 }
   0xf   : > { %s600_s20 = scalar_select %p36_p7, %s516_s8, %s38_s15  }
  0x10   : > { %s725_s19 = scalar_select %p595_p9, 1, 0 }
  0x11   : > { %p602_p11 = por %p83_p10, %p51_p3  ;;  %s103_s22 = sand.u32 1, %s516_s8  }
  0x12   : > { %s341_s23 = sshll.u32 %s103_s22, 6  ;;  %s351_s24 = sshll.u32 %s524_s10, 10 }
  0x13   : > { %s726_s21 = scalar_select %p602_p11, 1, 0 }
  0x14   : > { %s613_s27 = scalar_lea.hbm %s720_s0, %s351_s24  ;;  %s107_s28 = scalar_lea.vmem [#allocation2], %s341_s23 }
  0x15   : > { %s115_s29 = sshll.u32 %s107_s28, 4  ;;  %p619_p0 = pnand %p364_p13, %p585_p4  ;;  %s615_s29 = int_to_ptr.vmem [resolvable:$true] %s115_s29 }
  0x16   : > { %s624_s2 = scalar_lea.sflag [#allocation3], %s103_s22  ;;  %s416_s3 = scalar_lea.hbm %s613_s27, 1024 }
  0x17   : > { %p417_p2 = scmp.ne.s32.totalorder %s613_s27, %s416_s3  ;;  %p418_p3 = pneg %p619_p0 }
  0x18   : > { %s421_s12 = scalar_lea.hbm %s720_s0, 2048  ;;  %p422_p4 = scmp.lt.u32.totalorder %s613_s27, %s720_s0 }
  0x19   : > { %p419_p5 = pnand %p418_p3, %p417_p2  ;;  %p423_p7 = scmp.lt.u32.totalorder %s421_s12, %s416_s3 }
  0x1a   : > { %p425_p13 = scmp.lt.u32.totalorder %s416_s3, %s613_s27 }
  0x1b   : > { %p420_p6 = pneg %p419_p5  ;;  %p424_p10 = por %p423_p7, %p422_p4 }
  0x1d   : > { %p426_p12 = por %p425_p13, %p424_p10 }
  0x1f   : > { %p427_p1 = pnand %p426_p12, %p420_p6 }
  0x21   : > { %430 = shalt.err (!%p427_p1)
}
  0x22   : > { %s431_s16 = scalar_lea.vmem %s615_s29, 1024  ;;  %s530_s17 = smov [#allocation2]  }
  0x23   : > { %p432_p2 = scmp.ne.s32.totalorder %s615_s29, %s431_s16  ;;  %s436_s22 = sshll.u32 %s530_s17, 4  ;;  %s437_s22 = int_to_ptr.vmem [resolvable:$false] %s436_s22 }
  0x24   : > { %s438_s23 = scalar_lea.vmem %s437_s22, 2048  ;;  %p439_p9 = scmp.lt.s32.totalorder %s615_s29, %s437_s22 }
  0x25   : > { %p434_p5 = pnand %p432_p2, %p418_p3  ;;  %p440_p4 = scmp.lt.s32.totalorder %s438_s23, %s431_s16 }
  0x27   : > { %p435_p11 = pneg %p434_p5  ;;  %p441_p7 = por %p440_p4, %p439_p9 }
  0x29   : > { %p442_p10 = pnand %p441_p7, %p435_p11 }
  0x2b   : > { %445 = shalt.err (!%p442_p10)
}
  0x2c   : > { %s531_s24 = smov 128   ;;  %s532_s25 = smov 8  }
  0x2d   : > { %359 = dma.hbm_to_vmem [thread:$0]  (!%p619_p0), %s613_s27, 1024, %s615_s29, %s624_s2, %s531_s24, %s531_s24, %s532_s25  }
  0x2e   : > { %p123_p12 = scmp.lt.s32.totalorder %s528_s11, 3  ;;  %p728_p1 = scmp.ge.s32.totalorder %s528_s11, 1 }
  0x30   : > { %p124_p3 = pnand %p728_p1, %p123_p12 }
  0x31   : > { %s656_s26 = sand.u32 (!%p124_p3), 1, %s512_s7  }
  0x32   : > { %127 = sbr.rel (%p124_p3) target bundleno = 94 (0x5e), region = 24  ;;  %s345_s28 = sshll.u32 (!%p124_p3), %s656_s26, 6 }
  0x33   : > { %s130_s3 = scalar_lea.sflag (!%p124_p3), [#allocation3], %s656_s26  ;;  %s133_s4 = scalar_lea.vmem (!%p124_p3), [#allocation2], %s345_s28 }
  0x39   : > { %499 = dma.done.wait (%p591_p8), %s130_s3, 1024  }
  0x3a   : > { %501 = vsyncadd (%p591_p8), %s130_s3, 4294966272  ;;  %v153_v0 = vld [vmem:[%s133_s4] sm:$0xff]  ;;  %v154_v1 = vld [vmem:[%s133_s4 + $0x8] sm:$0xff]  ;;  %vm225_vm0 = vcmask 1041409   ;;  %vm227_vm1 = vcmask 1042434   ;;  %s346_s18 = sshll.u32 %s656_s26, 3 }
  0x3b   : > { %v155_v2 = vld [vmem:[%s133_s4 + $0x10] sm:$0xff]  ;;  %v156_v3 = vld [vmem:[%s133_s4 + $0x18] sm:$0xff]  ;;  %v157_v4 = vld [vmem:[%s133_s4 + $0x20] sm:$0xff]  ;;  %v161_v6 = vrot.slane %v153_v0, 4  ;;  %v167_v7 = vrot.slane %v154_v1, 4  ;;  %vm229_vm2 = vcmask 1043459  }
  0x3c   : > { %v158_v5 = vld [vmem:[%s133_s4 + $0x28] sm:$0xff]  ;;  %v173_v8 = vrot.slane %v155_v2, 4  ;;  %v159_v9 = vld [vmem:[%s133_s4 + $0x30] sm:$0xff]  ;;  %v160_v10 = vld [vmem:[%s133_s4 + $0x38] sm:$0xff]  ;;  %v179_v11 = vrot.slane %v156_v3, 4  ;;  %v185_v12 = vrot.slane %v157_v4, 4 }
  0x3d   : > { %v191_v13 = vrot.slane %v158_v5, 4  ;;  %v162_v14 = vadd.f32 %v161_v6, %v153_v0  ;;  %v168_v15 = vadd.f32 %v167_v7, %v154_v1  ;;  %v197_v17 = vrot.slane %v159_v9, 4  ;;  %s151_s27 = scalar_lea.vmem [#allocation5], %s346_s18  ;;  %s348_s30 = sshll.u32 %s520_s9, 7 }
  0x3e   : > { %v174_v16 = vadd.f32 %v173_v8, %v155_v2  ;;  %v180_v18 = vadd.f32 %v179_v11, %v156_v3  ;;  %v186_v19 = vadd.f32 %v185_v12, %v157_v4  ;;  %v203_v21 = vrot.slane %v160_v10, 4  ;;  %s256_s29 = sshll.u32 %s151_s27, 4  ;;  %s673_s12 = scalar_lea.hbm %s721_s1, %s348_s30  ;;  %s668_s29 = int_to_ptr.vmem [resolvable:$true] %s256_s29 }
  0x3f   : > { %v192_v20 = vadd.f32 %v191_v13, %v158_v5  ;;  %v163_v22 = vrot.slane %v162_v14, 2  ;;  %v169_v23 = vrot.slane %v168_v15, 2  ;;  %v198_v25 = vadd.f32 %v197_v17, %v159_v9  ;;  %s242_s13 = scalar_lea.sflag [#allocation4], %s656_s26  ;;  %s446_s15 = scalar_lea.vmem %s668_s29, 128 }
  0x40   : > { %v175_v24 = vrot.slane %v174_v16, 2  ;;  %v181_v26 = vrot.slane %v180_v18, 2  ;;  %v187_v27 = vrot.slane %v186_v19, 2  ;;  %v204_v29 = vadd.f32 %v203_v21, %v160_v10  ;;  %p447_p8 = scmp.ne.s32.totalorder %s668_s29, %s446_s15  ;;  %p729_p9 = scmp.ne.s32.totalorder %s725_s19, 0 }
  0x41   : > { %v193_v28 = vrot.slane %v192_v20, 2  ;;  %v164_v30 = vadd.f32 %v163_v22, %v162_v14  ;;  %v170_v31 = vadd.f32 %v169_v23, %v168_v15  ;;  %v199_v33 = vrot.slane %v198_v25, 2  ;;  %s533_s9 = smov [#allocation5]  }
  0x42   : > { %v176_v32 = vadd.f32 %v175_v24, %v174_v16  ;;  %v182_v34 = vadd.f32 %v181_v26, %v180_v18  ;;  %v188_v35 = vadd.f32 %v187_v27, %v186_v19  ;;  %v205_v37 = vrot.slane %v204_v29, 2  ;;  %p448_p11 = pnand %p447_p8, %p729_p9  ;;  %s450_s16 = sshll.u32 %s533_s9, 4  ;;  %s451_s16 = int_to_ptr.vmem [resolvable:$false] %s450_s16 }
  0x43   : > { %v194_v36 = vadd.f32 %v193_v28, %v192_v20  ;;  %v165_v38 = vrot.slane %v164_v30, 1  ;;  %v171_v39 = vrot.slane %v170_v31, 1  ;;  %v200_v41 = vadd.f32 %v199_v33, %v198_v25  ;;  %s452_s17 = scalar_lea.vmem %s451_s16, 256  ;;  %p453_p6 = scmp.lt.s32.totalorder %s668_s29, %s451_s16 }
  0x44   : > { %v177_v40 = vrot.slane %v176_v32, 1  ;;  %v183_v42 = vrot.slane %v182_v34, 1  ;;  %v189_v43 = vrot.slane %v188_v35, 1  ;;  %v206_v45 = vadd.f32 %v205_v37, %v204_v29  ;;  %p449_p0 = pneg %p448_p11  ;;  %p454_p13 = scmp.lt.s32.totalorder %s452_s17, %s446_s15 }
  0x45   : > { %v195_v44 = vrot.slane %v194_v36, 1  ;;  %v166_v46 = vadd.f32 %v165_v38, %v164_v30  ;;  %v172_v47 = vadd.f32 %v171_v39, %v170_v31  ;;  %v201_v49 = vrot.slane %v200_v41, 1 }
  0x46   : > { %v178_v48 = vadd.f32 %v177_v40, %v176_v32  ;;  %v184_v50 = vadd.f32 %v183_v42, %v182_v34  ;;  %v190_v51 = vadd.f32 %v189_v43, %v188_v35  ;;  %v207_v53 = vrot.slane %v206_v45, 1  ;;  %p455_p2 = por %p454_p13, %p453_p6 }
  0x47   : > { %v196_v52 = vadd.f32 %v195_v44, %v194_v36  ;;  %v202_v54 = vadd.f32 %v201_v49, %v200_v41  ;;  %v209_v55 = vmul.f32 0.125, %v166_v46  ;;  %v210_v56 = vmul.f32 0.125, %v172_v47 }
  0x48   : > { %v211_v57 = vmul.f32 0.125, %v178_v48  ;;  %v208_v58 = vadd.f32 %v207_v53, %v206_v45  ;;  %v212_v59 = vmul.f32 0.125, %v184_v50  ;;  %v213_v60 = vmul.f32 0.125, %v190_v51  ;;  %p456_p5 = pnand %p455_p2, %p449_p0 }
  0x49   : > { %v214_v61 = vmul.f32 0.125, %v196_v52  ;;  %v226_v62 = vsel %vm225_vm0, %v210_v56, %v209_v55  ;;  %vm231_vm3 = vcmask 1044484   ;;  %v215_v63 = vmul.f32 0.125, %v202_v54 }
  0x4a   : > { %v228_v0 = vsel %vm227_vm1, %v211_v57, %v226_v62  ;;  %vm233_vm4 = vcmask 1045509   ;;  %v216_v1 = vmul.f32 0.125, %v208_v58  ;;  %vm235_vm5 = vcmask 1046534  }
  0x4b   : > { %v230_v2 = vsel %vm229_vm2, %v212_v59, %v228_v0  ;;  %vm237_vm6 = vcmask 1047559  }
  0x4c   : > { %v232_v3 = vsel %vm231_vm3, %v213_v60, %v230_v2 }
  0x4d   : > { %v234_v4 = vsel %vm233_vm4, %v214_v61, %v232_v3 }
  0x4e   : > { %v236_v5 = vsel %vm235_vm5, %v215_v63, %v234_v4 }
  0x4f   : > { %v238_v6 = vsel %vm237_vm6, %v216_v1, %v236_v5 }
  0x50   : > { %240 = vst [vmem:[%s151_s27] sm:$0xff] %v238_v6 }
  0x51   : > { %459 = shalt.err (!%p456_p5)
}
  0x52   : > { %s460_s22 = scalar_lea.hbm %s673_s12, 128  ;;  %s464_s25 = scalar_lea.hbm %s721_s1, 256 }
  0x53   : > { %p461_p4 = scmp.ne.s32.totalorder %s673_s12, %s460_s22  ;;  %p465_p12 = scmp.lt.u32.totalorder %s673_s12, %s721_s1 }
  0x54   : > { %p466_p1 = scmp.lt.u32.totalorder %s464_s25, %s460_s22  ;;  %p468_p8 = scmp.lt.u32.totalorder %s460_s22, %s673_s12 }
  0x55   : > { %p462_p7 = pnand %p461_p4, %p729_p9 }
  0x56   : > { %p467_p3 = por %p466_p1, %p465_p12 }
  0x57   : > { %p463_p10 = pneg %p462_p7 }
  0x58   : > { %p469_p11 = por %p468_p8, %p467_p3 }
  0x5a   : > { %p470_p0 = pnand %p469_p11, %p463_p10 }
  0x5c   : > { %473 = shalt.err (!%p470_p0)
}
  0x5d   : > { %354 = dma.vmem_to_hbm [thread:$0]  (%p729_p9), %s668_s29, 128, %s673_s12, %s242_s13  }
  0x5e PF: > { %s268_s3 = sand.u32 1, %s508_s6   ;;  %p730_p6 = scmp.ne.s32.totalorder %s726_s21, 0 }
  0x5f   : > { %p731_p13 = scmp.ge.s32.totalorder %s528_s11, 2  ;;  %s269_s4 = scalar_lea.sflag [#allocation4], %s268_s3 }
  0x61   : > { %p361_p2 = pnand %p731_p13, %p730_p6 }
  0x63   : > { %503 = dma.done.wait (!%p361_p2), %s269_s4, 128  }
  0x64   : > { %505 = vsyncadd (!%p361_p2), %s269_s4, 4294967168  ;;  %s17_s11 = sadd.s32 1, %s528_s11   ;;  %s732_s6 = smov %s512_s7 }
  0x65   : > { %p14_p5 = scmp.ge.s32.totalorder %s17_s11, 4   ;;  %s733_s7 = smov %s516_s8 }
  0x66   : > { %s734_s8 = smov %s600_s20  ;;  %s735_s9 = smov %s524_s10 }
  0x67   : > { %s736_s10 = smov %s738_s14  ;;  %16 = sbr.rel (!%p14_p5) target bundleno = 6 (0x6), region = 69 }
  0x6e   :  { %274 = vsyncpa [#allocation3], 1 }
  0x6f   :  { %276 = vsyncpa [#allocation3 + $0x1], 1 }
  0x70   :  { %277 = vsyncpa [#allocation4], 1 }
  0x71   :  { %279 = vsyncpa [#allocation4 + $0x1], 1 }

</bundles_post_ra>
